<compile_context>
chip_gen: v7x
topology: tpu7x:2x2x1
jax: 0.10.0
libtpu: 0.0.40
codegen_flags: <defaults>
</compile_context>

<pallas_src>
import jax
import jax.numpy as jnp
from jax.experimental import pallas as pl
from jax.experimental.pallas import tpu as pltpu


# ----------------------------- helpers ------------------------------------


def _round_up(x, m):
    return ((x + m - 1) // m) * m


def _round_down(x, m):
    return max(m, (x // m) * m)


def _sublane(dtype):
    # sublane packing: 8 rows for f32, 16 for bf16, 32 for int8/fp8
    return max(8, 32 // jnp.dtype(dtype).itemsize)


def _num_tensorcores():
    """Best-effort TensorCore count per chip (2 on v7x, else 1)."""
    try:
        kind = str(getattr(jax.devices()[0], "device_kind", "")).lower()
        if "v7" in kind or "tpu7" in kind:
            return 2
    except Exception:
        pass
    return 1


def _choose_batch_tile(B, input_size, hidden_size, matmul_dtype,
                       *, num_cores=1,
                       budget_bytes=16 * 1024 * 1024, max_rows=8192):
    elt = jnp.dtype(matmul_dtype).itemsize
    align = _sublane(matmul_dtype)
    # per-row double-buffered tile bytes: x (matmul dtype) + h/out/att (f32-ish)
    per_row = input_size * elt + (2 * hidden_size + 1) * 4
    tb = budget_bytes // (2 * per_row)
    tb = int(min(tb, max_rows, B))
    if num_cores > 1 and B >= num_cores * align:
        # guarantee >= num_cores grid steps so megacore sharding has work
        tb = min(tb, _round_up(-(-B // num_cores), align))
    if tb < B:
        tb = _round_down(tb, align)
    return max(1, tb)


def _vmem_limit(tb, input_size, H, elt):
    io = 2 * tb * (input_size * elt + (2 * H + 1) * 4)      # double-buffered tiles
    w = (input_size + H) * 2 * H * elt + 2 * 2 * H * 4      # resident weights + biases
    scratch = 8 * tb * H * 4                                 # f32 intermediates
    # cap well below v7x's 64 MiB physical VMEM; fine on v5e/v6e's 128 MiB
    return int(min(max(2 * (io + w + scratch), 16 * 2 ** 20), 48 * 2 ** 20))


# ----------------------------- kernels ------------------------------------


def _agru_cell_kernel(x_ref, h_ref, att_ref, w_ih_ref, w_hh_ref,
                      b_ih_ref, b_hh_ref, out_ref):
    H = out_ref.shape[-1]
    md = w_ih_ref.dtype
    x = x_ref[...]                               # (TB, I)  matmul dtype
    h32 = h_ref[...].astype(jnp.float32)         # (TB, H)  full precision
    att = att_ref[...]                           # (TB, 1)  f32

    # Two fused gate projections; columns [0:H] = r-chunk, [H:2H] = n-chunk.
    gi = jnp.dot(x, w_ih_ref[...], preferred_element_type=jnp.float32) + b_ih_ref[...]
    gh = jnp.dot(h32.astype(md), w_hh_ref[...],
                 preferred_element_type=jnp.float32) + b_hh_ref[...]

    reset_gate = jax.nn.sigmoid(gi[:, :H] + gh[:, :H])          # f32, EUP
    new_state = jnp.tanh(gi[:, H:] + reset_gate * gh[:, H:])    # f32, EUP

    out_ref[...] = ((1.0 - att) * h32 + att * new_state).astype(out_ref.dtype)


def _agru_seq_kernel(x_ref, att_ref, h0_ref, w_ih_ref, w_hh_ref,
                     b_ih_ref, b_hh_ref, out_ref, h_sc):
    H = h_sc.shape[-1]
    t = pl.program_id(1)
    md = w_ih_ref.dtype

    @pl.when(t == 0)
    def _():
        h_sc[...] = h0_ref[...].astype(jnp.float32)

    h32 = h_sc[...]                              # (TB, H) f32 carried state
    x = x_ref[0]                                 # (TB, I) matmul dtype
    att = att_ref[0]                             # (TB, 1) f32

    gi = jnp.dot(x, w_ih_ref[...], preferred_element_type=jnp.float32) + b_ih_ref[...]
    gh = jnp.dot(h32.astype(md), w_hh_ref[...],
                 preferred_element_type=jnp.float32) + b_hh_ref[...]

    reset_gate = jax.nn.sigmoid(gi[:, :H] + gh[:, :H])
    new_state = jnp.tanh(gi[:, H:] + reset_gate * gh[:, H:])
    hy = (1.0 - att) * h32 + att * new_state

    h_sc[...] = hy
    out_ref[0] = hy.astype(out_ref.dtype)


# ----------------------------- wrappers -----------------------------------


def prepare_agru_weights(weight_ih, weight_hh, bias_ih, bias_hh,
                         matmul_dtype=jnp.bfloat16):
    """One-time weight prep. Hoist this OUT of any sequence/timestep loop."""
    H = weight_hh.shape[1]
    w_ih = jnp.concatenate(
        [weight_ih[0 * H:1 * H, :].T, weight_ih[2 * H:3 * H, :].T], axis=1
    ).astype(matmul_dtype)                                        # (I, 2H)
    w_hh = jnp.concatenate(
        [weight_hh[0 * H:1 * H, :].T, weight_hh[2 * H:3 * H, :].T], axis=1
    ).astype(matmul_dtype)                                        # (H, 2H)
    b_ih = jnp.concatenate(
        [bias_ih[0 * H:1 * H], bias_ih[2 * H:3 * H]]
    ).reshape(1, 2 * H).astype(jnp.float32)
    b_hh = jnp.concatenate(
        [bias_hh[0 * H:1 * H], bias_hh[2 * H:3 * H]]
    ).reshape(1, 2 * H).astype(jnp.float32)
    return w_ih, w_hh, b_ih, b_hh


def _sanitize_block_b(block_b, B, matmul_dtype):
    tb = min(int(block_b), B)
    if tb < B:
        tb = _round_down(tb, _sublane(matmul_dtype))
    return tb


def agru_cell_prepared(inputs, hx, att_score, w_ih, w_hh, b_ih, b_hh,
                       *, block_b=None):
    """Single-step AGRU forward with pre-fused weights (prepare_agru_weights)."""
    B, input_size = inputs.shape
    H = hx.shape[1]
    md = w_ih.dtype
    elt = jnp.dtype(md).itemsize

    x = inputs.astype(md)
    h = hx                                        # keep original precision for the blend
    att = att_score.reshape(B, 1).astype(jnp.float32)

    if block_b is None:
        tb = _choose_batch_tile(B, input_size, H, md, num_cores=_num_tensorcores())
    else:
        tb = _sanitize_block_b(block_b, B, md)
    grid = (pl.cdiv(B, tb),)

    return pl.pallas_call(
        _agru_cell_kernel,
        out_shape=jax.ShapeDtypeStruct((B, H), hx.dtype),
        grid=grid,
        in_specs=[
            pl.BlockSpec((tb, input_size), lambda i: (i, 0)),        # x tile
            pl.BlockSpec((tb, H), lambda i: (i, 0)),                 # h tile (orig dtype)
            pl.BlockSpec((tb, 1), lambda i: (i, 0)),                 # att tile
            pl.BlockSpec((input_size, 2 * H), lambda i: (0, 0)),     # fused W_ih (resident)
            pl.BlockSpec((H, 2 * H), lambda i: (0, 0)),              # fused W_hh (resident)
            pl.BlockSpec((1, 2 * H), lambda i: (0, 0)),              # fused b_ih (resident)
            pl.BlockSpec((1, 2 * H), lambda i: (0, 0)),              # fused b_hh (resident)
        ],
        out_specs=pl.BlockSpec((tb, H), lambda i: (i, 0)),
        compiler_params=pltpu.CompilerParams(
            dimension_semantics=("parallel",),
            vmem_limit_bytes=_vmem_limit(tb, input_size, H, elt)),
    )(x, h, att, w_ih, w_hh, b_ih, b_hh)


def agru_sequence_prepared(x_seq, hx, att_seq, w_ih, w_hh, b_ih, b_hh,
                           *, block_b=None):
    """Fused DIEN sequence loop: ONE pallas_call for all timesteps.

    x_seq: (T, B, I) time-major, att_seq: (T, B), hx: (B, H).
    Returns all hidden states, time-major (T, B, H). h is carried in a VMEM
    scratch across the 'arbitrary' time axis; fused weights stay VMEM-resident
    for the whole sequence.
    """
    T, B, input_size = x_seq.shape
    H = hx.shape[1]
    md = w_ih.dtype
    elt = jnp.dtype(md).itemsize

    x = x_seq.astype(md)
    att = att_seq.reshape(T, B, 1).astype(jnp.float32)

    if block_b is None:
        tb = _choose_batch_tile(B, input_size, H, md, num_cores=_num_tensorcores())
    else:
        tb = _sanitize_block_b(block_b, B, md)
    grid = (pl.cdiv(B, tb), T)

    return pl.pallas_call(
        _agru_seq_kernel,
        out_shape=jax.ShapeDtypeStruct((T, B, H), hx.dtype),
        grid=grid,
        in_specs=[
            pl.BlockSpec((1, tb, input_size), lambda i, t: (t, i, 0)),   # x[t] tile
            pl.BlockSpec((1, tb, 1), lambda i, t: (t, i, 0)),            # att[t] tile
            pl.BlockSpec((tb, H), lambda i, t: (i, 0)),                  # h0 (per batch tile)
            pl.BlockSpec((input_size, 2 * H), lambda i, t: (0, 0)),      # fused W_ih (resident)
            pl.BlockSpec((H, 2 * H), lambda i, t: (0, 0)),               # fused W_hh (resident)
            pl.BlockSpec((1, 2 * H), lambda i, t: (0, 0)),               # fused b_ih (resident)
            pl.BlockSpec((1, 2 * H), lambda i, t: (0, 0)),               # fused b_hh (resident)
        ],
        out_specs=pl.BlockSpec((1, tb, H), lambda i, t: (t, i, 0)),
        scratch_shapes=[pltpu.VMEM((tb, H), jnp.float32)],               # carried h
        compiler_params=pltpu.CompilerParams(
            dimension_semantics=("parallel", "arbitrary"),
            vmem_limit_bytes=_vmem_limit(tb, input_size, H, elt)),
    )(x, att, hx, w_ih, w_hh, b_ih, b_hh)


def agru_cell(inputs, hx, att_score, weight_ih, weight_hh, bias_ih, bias_hh,
              *, matmul_dtype=jnp.bfloat16, block_b=None):
    """Drop-in forward matching the PyTorch AGRUCell signature.

    For a DIEN sequence, call prepare_agru_weights once and then
    agru_sequence_prepared (whole sequence fused) instead of per-step calls.
    """
    w_ih, w_hh, b_ih, b_hh = prepare_agru_weights(
        weight_ih, weight_hh, bias_ih, bias_hh, matmul_dtype=matmul_dtype)
    return agru_cell_prepared(inputs, hx, att_score, w_ih, w_hh, b_ih, b_hh,
                              block_b=block_b)


def agru_cell_ref(inputs, hx, att_score, weight_ih, weight_hh, bias_ih, bias_hh):
    """Pure-JAX reference mirroring the PyTorch module."""
    gi = inputs @ weight_ih.T + bias_ih
    gh = hx @ weight_hh.T + bias_hh
    H = hx.shape[1]
    i_r, _, i_n = gi[:, :H], gi[:, H:2 * H], gi[:, 2 * H:]
    h_r, _, h_n = gh[:, :H], gh[:, H:2 * H], gh[:, 2 * H:]
    reset_gate = jax.nn.sigmoid(i_r + h_r)
    new_state = jnp.tanh(i_n + reset_gate * h_n)
    att = att_score.reshape(-1, 1)
    return (1.0 - att) * hx + att * new_state


if __name__ == "__main__":
    key = jax.random.PRNGKey(0)
    B, input_size, hidden_size = 8, 16, 32

    k1, k2, k3, k4, k5 = jax.random.split(key, 5)
    # Module zero-inits only biases; weights are uninitialized in __init__,
    # so use small deterministic random values here.
    weight_ih = 0.1 * jax.random.normal(k1, (3 * hidden_size, input_size), jnp.float32)
    weight_hh = 0.1 * jax.random.normal(k2, (3 * hidden_size, hidden_size), jnp.float32)
    bias_ih = jnp.zeros((3 * hidden_size,), jnp.float32)
    bias_hh = jnp.zeros((3 * hidden_size,), jnp.float32)

    inputs = jax.random.normal(k3, (B, input_size), jnp.float32)
    hx = jax.random.normal(k4, (B, hidden_size), jnp.float32)
    att_score = jax.random.uniform(k5, (B,), jnp.float32)

    ref = agru_cell_ref(inputs, hx, att_score, weight_ih, weight_hh, bias_ih, bias_hh)

    # 1) f32 matmul path — tight tolerance.
    out_f32 = jax.block_until_ready(
        agru_cell(inputs, hx, att_score, weight_ih, weight_hh, bias_ih, bias_hh,
                  matmul_dtype=jnp.float32))
    assert out_f32.shape == (B, hidden_size)
    assert jnp.allclose(out_f32, ref, atol=1e-5, rtol=1e-5), "f32 mismatch vs reference"

    # 2) default bf16 matmul path — bf16 tolerance (blend stays f32 in-kernel).
    out_bf16 = jax.block_until_ready(
        agru_cell(inputs, hx, att_score, weight_ih, weight_hh, bias_ih, bias_hh))
    assert jnp.allclose(out_bf16, ref, atol=2e-2, rtol=2e-2), "bf16 mismatch vs reference"

    # 3) ragged batch tiling (B % block_b != 0) with multiple grid steps.
    B2 = 50
    k6, k7, k8 = jax.random.split(k5, 3)
    inputs2 = jax.random.normal(k6, (B2, input_size), jnp.float32)
    hx2 = jax.random.normal(k7, (B2, hidden_size), jnp.float32)
    att2 = jax.random.uniform(k8, (B2,), jnp.float32)
    ref2 = agru_cell_ref(inputs2, hx2, att2, weight_ih, weight_hh, bias_ih, bias_hh)
    out2 = jax.block_until_ready(
        agru_cell(inputs2, hx2, att2, weight_ih, weight_hh, bias_ih, bias_hh, block_b=16))
    assert jnp.allclose(out2, ref2, atol=2e-2, rtol=2e-2), "ragged-B mismatch vs reference"

    # 4) fused sequence kernel (DIEN inner loop): f32 tight + bf16 loose.
    T, B3 = 12, 16
    k9, k10, k11 = jax.random.split(k8, 3)
    x_seq = jax.random.normal(k9, (T, B3, input_size), jnp.float32)
    h0 = jax.random.normal(k10, (B3, hidden_size), jnp.float32)
    att_seq = jax.random.uniform(k11, (T, B3), jnp.float32)

    def seq_ref(x_seq, h0, att_seq):
        h = h0
        hs = []
        for t in range(x_seq.shape[0]):
            h = agru_cell_ref(x_seq[t], h, att_seq[t],
                              weight_ih, weight_hh, bias_ih, bias_hh)
            hs.append(h)
        return jnp.stack(hs, axis=0)

    ref_seq = seq_ref(x_seq, h0, att_seq)

    w_ih32, w_hh32, b_ih32, b_hh32 = prepare_agru_weights(
        weight_ih, weight_hh, bias_ih, bias_hh, matmul_dtype=jnp.float32)
    out_seq32 = jax.block_until_ready(
        agru_sequence_prepared(x_seq, h0, att_seq, w_ih32, w_hh32, b_ih32, b_hh32))
    assert out_seq32.shape == (T, B3, hidden_size)
    assert jnp.allclose(out_seq32, ref_seq, atol=1e-4, rtol=1e-4), "seq f32 mismatch"

    w_ih16, w_hh16, b_ih16, b_hh16 = prepare_agru_weights(
        weight_ih, weight_hh, bias_ih, bias_hh, matmul_dtype=jnp.bfloat16)
    out_seq16 = jax.block_until_ready(
        agru_sequence_prepared(x_seq, h0, att_seq, w_ih16, w_hh16, b_ih16, b_hh16))
    assert jnp.allclose(out_seq16, ref_seq, atol=5e-2, rtol=5e-2), "seq bf16 mismatch"

    print("KERNEL_OK")
</pallas_src>

<mosaic_0001>
module attributes {stable_mosaic.version = 11 : i64} {
  func.func @_agru_cell_kernel(%arg0: i32, %arg1: memref<8x16xf32, #tpu.memory_space<vmem>>, %arg2: memref<8x32xf32, #tpu.memory_space<vmem>>, %arg3: memref<8x1xf32, #tpu.memory_space<vmem>>, %arg4: memref<16x64xf32, #tpu.memory_space<vmem>>, %arg5: memref<32x64xf32, #tpu.memory_space<vmem>>, %arg6: memref<1x64xf32, #tpu.memory_space<vmem>>, %arg7: memref<1x64xf32, #tpu.memory_space<vmem>>, %arg8: memref<8x32xf32, #tpu.memory_space<vmem>>) attributes {dimension_semantics = [#tpu.dimension_semantics<parallel>], iteration_bounds = array<i64: 1>, scalar_prefetch = 0 : i64, scratch_operands = 0 : i64, tpu.core_type = #tpu.core_type<tc>, window_params = [{transform_indices = @transform_0, window_bounds = array<i64: 8, 16>}, {transform_indices = @transform_1, window_bounds = array<i64: 8, 32>}, {transform_indices = @transform_2, window_bounds = array<i64: 8, 1>}, {pipeline_mode = #tpu.pipeline_mode<synchronous>, transform_indices = @transform_3, window_bounds = array<i64: 16, 64>}, {pipeline_mode = #tpu.pipeline_mode<synchronous>, transform_indices = @transform_4, window_bounds = array<i64: 32, 64>}, {pipeline_mode = #tpu.pipeline_mode<synchronous>, transform_indices = @transform_5, window_bounds = array<i64: 1, 64>}, {pipeline_mode = #tpu.pipeline_mode<synchronous>, transform_indices = @transform_6, window_bounds = array<i64: 1, 64>}, {transform_indices = @transform_7, window_bounds = array<i64: 8, 32>}]} {
    %c0 = arith.constant 0 : index
    %c0_0 = arith.constant 0 : index
    %0 = vector.load %arg1[%c0, %c0_0] : memref<8x16xf32, #tpu.memory_space<vmem>>, vector<8x16xf32>
    %c0_1 = arith.constant 0 : index
    %c0_2 = arith.constant 0 : index
    %1 = vector.load %arg2[%c0_1, %c0_2] : memref<8x32xf32, #tpu.memory_space<vmem>>, vector<8x32xf32>
    %c0_3 = arith.constant 0 : index
    %c0_4 = arith.constant 0 : index
    %2 = vector.load %arg3[%c0_3, %c0_4] : memref<8x1xf32, #tpu.memory_space<vmem>>, vector<8x1xf32>
    %c0_5 = arith.constant 0 : index
    %c0_6 = arith.constant 0 : index
    %3 = vector.load %arg4[%c0_5, %c0_6] : memref<16x64xf32, #tpu.memory_space<vmem>>, vector<16x64xf32>
    %cst = arith.constant dense<0.000000e+00> : vector<8x64xf32>
    %4 = tpu.matmul %0, %3, %cst {dimension_numbers = #tpu.dot_dimension_numbers<[1], [0], [0], [1], [0, 0, 1, 1], [], []>} : vector<8x16xf32>, vector<16x64xf32>, vector<8x64xf32> -> vector<8x64xf32>
    %c0_7 = arith.constant 0 : index
    %c0_8 = arith.constant 0 : index
    %5 = vector.load %arg6[%c0_7, %c0_8] : memref<1x64xf32, #tpu.memory_space<vmem>>, vector<1x64xf32>
    %6 = vector.broadcast %5 : vector<1x64xf32> to vector<8x64xf32>
    %7 = arith.addf %4, %6 : vector<8x64xf32>
    %c0_9 = arith.constant 0 : index
    %c0_10 = arith.constant 0 : index
    %8 = vector.load %arg5[%c0_9, %c0_10] : memref<32x64xf32, #tpu.memory_space<vmem>>, vector<32x64xf32>
    %cst_11 = arith.constant dense<0.000000e+00> : vector<8x64xf32>
    %9 = tpu.matmul %1, %8, %cst_11 {dimension_numbers = #tpu.dot_dimension_numbers<[1], [0], [0], [1], [0, 0, 1, 1], [], []>} : vector<8x32xf32>, vector<32x64xf32>, vector<8x64xf32> -> vector<8x64xf32>
    %c0_12 = arith.constant 0 : index
    %c0_13 = arith.constant 0 : index
    %10 = vector.load %arg7[%c0_12, %c0_13] : memref<1x64xf32, #tpu.memory_space<vmem>>, vector<1x64xf32>
    %11 = vector.broadcast %10 : vector<1x64xf32> to vector<8x64xf32>
    %12 = arith.addf %9, %11 : vector<8x64xf32>
    %13 = vector.extract_strided_slice %7 {offsets = [0, 0], sizes = [8, 32], strides = [1, 1]} : vector<8x64xf32> to vector<8x32xf32>
    %14 = vector.extract_strided_slice %12 {offsets = [0, 0], sizes = [8, 32], strides = [1, 1]} : vector<8x64xf32> to vector<8x32xf32>
    %15 = arith.addf %13, %14 : vector<8x32xf32>
    %16 = arith.negf %15 : vector<8x32xf32>
    %17 = math.exp %16 : vector<8x32xf32>
    %cst_14 = arith.constant 1.000000e+00 : f32
    %18 = vector.broadcast %cst_14 : f32 to vector<8x32xf32>
    %19 = arith.addf %18, %17 : vector<8x32xf32>
    %20 = arith.divf %18, %19 : vector<8x32xf32>
    %21 = vector.extract_strided_slice %7 {offsets = [0, 32], sizes = [8, 32], strides = [1, 1]} : vector<8x64xf32> to vector<8x32xf32>
    %22 = vector.extract_strided_slice %12 {offsets = [0, 32], sizes = [8, 32], strides = [1, 1]} : vector<8x64xf32> to vector<8x32xf32>
    %23 = arith.mulf %20, %22 : vector<8x32xf32>
    %24 = arith.addf %21, %23 : vector<8x32xf32>
    %25 = math.tanh %24 : vector<8x32xf32>
    %cst_15 = arith.constant 1.000000e+00 : f32
    %26 = vector.broadcast %cst_15 : f32 to vector<8x1xf32>
    %27 = arith.subf %26, %2 : vector<8x1xf32>
    %28 = vector.broadcast %27 : vector<8x1xf32> to vector<8x32xf32>
    %29 = arith.mulf %28, %1 : vector<8x32xf32>
    %30 = vector.broadcast %2 : vector<8x1xf32> to vector<8x32xf32>
    %31 = arith.mulf %30, %25 : vector<8x32xf32>
    %32 = arith.addf %29, %31 : vector<8x32xf32>
    %c0_16 = arith.constant 0 : index
    %c0_17 = arith.constant 0 : index
    %33 = vector.load %arg8[%c0_16, %c0_17] : memref<8x32xf32, #tpu.memory_space<vmem>>, vector<8x32xf32>
    tpu.vector_store %arg8[%c0_16, %c0_17], %32 {strides = array<i32>} : memref<8x32xf32, #tpu.memory_space<vmem>>, vector<8x32xf32>,
    return
  }
  func.func @transform_0(%arg0: i32) -> (i32, i32) {
    %c0_i32 = arith.constant 0 : i32
    %c0_i32_0 = arith.constant 0 : i32
    return %arg0, %c0_i32 : i32, i32
  }
  func.func @transform_1(%arg0: i32) -> (i32, i32) {
    %c0_i32 = arith.constant 0 : i32
    %c0_i32_0 = arith.constant 0 : i32
    return %arg0, %c0_i32 : i32, i32
  }
  func.func @transform_2(%arg0: i32) -> (i32, i32) {
    %c0_i32 = arith.constant 0 : i32
    %c0_i32_0 = arith.constant 0 : i32
    return %arg0, %c0_i32 : i32, i32
  }
  func.func @transform_3(%arg0: i32) -> (i32, i32) {
    %c0_i32 = arith.constant 0 : i32
    %c0_i32_0 = arith.constant 0 : i32
    %c0_i32_1 = arith.constant 0 : i32
    return %c0_i32, %c0_i32_0 : i32, i32
  }
  func.func @transform_4(%arg0: i32) -> (i32, i32) {
    %c0_i32 = arith.constant 0 : i32
    %c0_i32_0 = arith.constant 0 : i32
    %c0_i32_1 = arith.constant 0 : i32
    return %c0_i32, %c0_i32_0 : i32, i32
  }
  func.func @transform_5(%arg0: i32) -> (i32, i32) {
    %c0_i32 = arith.constant 0 : i32
    %c0_i32_0 = arith.constant 0 : i32
    %c0_i32_1 = arith.constant 0 : i32
    return %c0_i32, %c0_i32_0 : i32, i32
  }
  func.func @transform_6(%arg0: i32) -> (i32, i32) {
    %c0_i32 = arith.constant 0 : i32
    %c0_i32_0 = arith.constant 0 : i32
    %c0_i32_1 = arith.constant 0 : i32
    return %c0_i32, %c0_i32_0 : i32, i32
  }
  func.func @transform_7(%arg0: i32) -> (i32, i32) {
    %c0_i32 = arith.constant 0 : i32
    %c0_i32_0 = arith.constant 0 : i32
    return %arg0, %c0_i32 : i32, i32
  }
}

</mosaic_0001>

<bundles_post_ra>
// kernel: tpu_custom_call.1
= control target key start
LH: loop header
LB: loop body
LE: loop exit
PB: predicated region body
PF: predicated region fallthrough
CT: control target
= control target key end

     0   :  { %12 = vsyncpa [#allocation3], 0  ;;  %s559_s0 = inlined_call_operand.hbm [shape: f32[8,16], index: 0, kind: input, shape index: {}]   ;;  %s560_s1 = inlined_call_operand.hbm [shape: f32[8,32], index: 1, kind: input, shape index: {}]   ;;  %s561_s2 = inlined_call_operand.vmem [shape: f32[8,1], index: 2, kind: input, shape index: {}]   ;;  %s562_s3 = inlined_call_operand.vmem [shape: f32[16,64], index: 3, kind: input, shape index: {}]   ;;  %s563_s4 = inlined_call_operand.hbm [shape: f32[32,64], index: 4, kind: input, shape index: {}]   ;;  %s564_s5 = inlined_call_operand.vmem [shape: f32[1,64], index: 5, kind: input, shape index: {}]   ;;  %s565_s6 = inlined_call_operand.vmem [shape: f32[1,64], index: 6, kind: input, shape index: {}]   ;;  %s566_s7 = inlined_call_operand.hbm [shape: f32[8,32], index: 7, kind: output, shape index: {}]  }
   0x1   :  { %13 = vsyncpa [#allocation6], 0 }
   0x2   :  { %14 = vsyncpa [#allocation4], 0  ;;  %s442_s24 = smov [#allocation5]   ;;  %s443_s26 = smov [#allocation2]  }
   0x3   :  { %s31_s25 = sshll.u32 %s442_s24, 4  ;;  %s21_s27 = sshll.u32 %s443_s26, 4  ;;  %s32_s25 = int_to_ptr.vmem [resolvable:$true] %s31_s25  ;;  %s22_s27 = int_to_ptr.vmem [resolvable:$true] %s21_s27 }
   0x4   :  { %s348_s30 = scalar_lea.hbm %s560_s1, 128 }
   0x5   :  { %p349_p0 = scmp.ne.s32.totalorder %s560_s1, %s348_s30  ;;  %p352_p1 = scmp.lt.u32.totalorder %s348_s30, %s560_s1 }
   0x7   :  { %p354_p2 = pnand %p352_p1, %p349_p0 }
   0x9   :  { %357 = shalt.err (!%p354_p2)
}
   0xa   :  { %s358_s12 = scalar_lea.vmem %s32_s25, 128  ;;  %p363_p4 = scmp.lt.s32.totalorder %s32_s25, %s32_s25 }
   0xb   :  { %p359_p3 = scmp.ne.s32.totalorder %s32_s25, %s358_s12  ;;  %p364_p5 = scmp.lt.s32.totalorder %s358_s12, %s358_s12 }
   0xd   :  { %p365_p6 = por %p364_p5, %p363_p4 }
   0xf   :  { %p366_p7 = pnand %p365_p6, %p359_p3 }
  0x11   :  { %369 = shalt.err (!%p366_p7)
}
  0x12   :  { %34 = dma.hbm_to_vmem [thread:$0]  %s560_s1, 128, %s32_s25, [#allocation6]  }
  0x13   :  { %s370_s17 = scalar_lea.hbm %s559_s0, 128 }
  0x14   :  { %p371_p8 = scmp.ne.s32.totalorder %s559_s0, %s370_s17  ;;  %p374_p9 = scmp.lt.u32.totalorder %s370_s17, %s559_s0 }
  0x16   :  { %p376_p10 = pnand %p374_p9, %p371_p8 }
  0x18   :  { %379 = shalt.err (!%p376_p10)
}
  0x19   :  { %s380_s22 = scalar_lea.vmem %s22_s27, 128  ;;  %p385_p12 = scmp.lt.s32.totalorder %s22_s27, %s22_s27 }
  0x1a   :  { %p381_p11 = scmp.ne.s32.totalorder %s22_s27, %s380_s22  ;;  %p386_p13 = scmp.lt.s32.totalorder %s380_s22, %s380_s22 }
  0x1c   :  { %p387_p0 = por %p386_p13, %p385_p12 }
  0x1e   :  { %p388_p1 = pnand %p387_p0, %p381_p11 }
  0x20   :  { %391 = shalt.err (!%p388_p1)
}
  0x21   :  { %24 = dma.hbm_to_vmem [thread:$0]  %s559_s0, 128, %s22_s27, [#allocation3]  }
  0x22   :  { %s444_s24 = smov [#allocation7]   ;;  %s392_s29 = scalar_lea.hbm %s563_s4, 512 }
  0x23   :  { %s44_s25 = sshll.u32 %s444_s24, 4  ;;  %p393_p2 = scmp.ne.s32.totalorder %s563_s4, %s392_s29  ;;  %s45_s25 = int_to_ptr.vmem [resolvable:$true] %s44_s25 }
  0x24   :  { %p396_p3 = scmp.lt.u32.totalorder %s392_s29, %s563_s4 }
  0x26   :  { %p398_p4 = pnand %p396_p3, %p393_p2 }
  0x28   :  { %401 = shalt.err (!%p398_p4)
}
  0x29   :  { %s402_s11 = scalar_lea.vmem %s45_s25, 512  ;;  %p407_p6 = scmp.lt.s32.totalorder %s45_s25, %s45_s25 }
  0x2a   :  { %p403_p5 = scmp.ne.s32.totalorder %s45_s25, %s402_s11  ;;  %p408_p7 = scmp.lt.s32.totalorder %s402_s11, %s402_s11 }
  0x2c   :  { %p409_p8 = por %p408_p7, %p407_p6 }
  0x2e   :  { %p410_p9 = pnand %p409_p8, %p403_p5 }
  0x30   :  { %413 = shalt.err (!%p410_p9)
}
  0x31   :  { %s445_s0 = smov 128   ;;  %s446_s27 = smov 8  }
  0x32   :  { %50 = dma.hbm_to_vmem [thread:$0]  %s563_s4, 512, %s45_s25, [#allocation6], %s445_s0, %s445_s0, %s446_s27  }
  0x33   :  { %436 = dma.done.wait [#allocation3], 128  }
  0x34   :  { %437 = vsyncadd [#allocation3], 4294967168 }
  0x35   :  { %438 = dma.done.wait [#allocation6], 640  }
  0x36   :  { %439 = vsyncadd [#allocation6], 4294966656  ;;  %v447_v0 = vmov 0.0|0.0   ;;  %vm448_vm0 = vmmov 0   ;;  %v449_v1 = vmov 0.0   ;;  %v150_v2 = vld [vmem:[#allocation7] sm:$0xff] }
  0x37   :  { %322 = vmatprep.subr.bf16.mxu1 %v447_v0  ;;  %319 = vmatprep.subr.bf16.mxu0 %v447_v0  ;;  %v151_v3 = vld [vmem:[#allocation7 + $0x8] sm:$0xff]  ;;  %v67_v4 = vld [vmem:[%s562_s3] sm:$0xff]  ;;  %v68_v6 = vld [vmem:[%s562_s3 + $0x8] sm:$0xff]  ;;  %vm76_vm1 = vcmask 130048   ;;  %vm161_vm2 = vcmask 261120   ;;  %v450_v14 = vmov 0  }
  0x38   :  { %305 = vmatprep.mubr.msk.f32.mxu0 %vm448_vm0, %v449_v1  ;;  %316 = vmatprep.mubr.msk.f32.mxu1 %vm448_vm0, %v449_v1  ;;  %v323_v5 = vpack.c.bf16 %v151_v3, %v150_v2  ;;  %v152_v7 = vld [vmem:[#allocation7 + $0x10] sm:$0xff]  ;;  %v153_v8 = vld [vmem:[#allocation7 + $0x18] sm:$0xff]  ;;  %v320_v9 = vpack.c.bf16 %v68_v6, %v67_v4  ;;  %s451_s20 = smov 96  }
  0x39   :  { %v326_v10 = vpack.c.bf16 %v153_v8, %v152_v7  ;;  %v64_v11 = vld [vmem:[#allocation2] sm:$0xff]  ;;  %v65_v12 = vld [vmem:[#allocation5] sm:$0xff]  ;;  %340 = vset.pattern.permute.xlu1 %v450_v14  ;;  %341 = vset.pattern.permute.xlu0 %v450_v14 }
  0x3a   :  { %324 = vmatpush3.bf16.msra.mxu1 %v323_v5  ;;  %321 = vmatpush3.bf16.msra.mxu0 %v320_v9  ;;  %v66_v13 = vld [vmem:[%s561_s2] sm:$0xff]  ;;  %s452_s2 = smov 32  }
  0x3b   :  { %325 = vmatprep.subr.bf16.mxu1 %v447_v0  ;;  %262 = vperm.xlu1 %340, %v66_v13   ;;  %v253_v15 = vsub.f32 1.0, %v66_v13  ;;  %v290_v17 = vld [vmem:[%s565_s6] ss:$0 sm:$0xff] }
  0x3c   :  { %v288_v22 = vld [vmem:[%s564_s5] ss:$0 sm:$0xff]  ;;  %s453_s5 = smov [#allocation8]  }
  0x3d   :  { %306 = vmatmul.mubr.msk.f32.vlgmr.msra.gmra.mrb[0].mxu0 %vm76_vm1, %v64_v11  ;;  %s278_s6 = sshll.u32 %s453_s5, 4  ;;  %s279_s6 = int_to_ptr.vmem [resolvable:$true] %s278_s6 }
  0x3e   :  { %327 = vmatpush3.bf16.msra.mxu1 %v326_v10  ;;  %s414_s1 = scalar_lea.vmem %s279_s6, 128  ;;  %p419_p11 = scmp.lt.s32.totalorder %s279_s6, %s279_s6 }
  0x3f   :  { %256 = vperm.xlu1 %340, %v253_v15   ;;  %p415_p10 = scmp.ne.s32.totalorder %s279_s6, %s414_s1  ;;  %p420_p12 = scmp.lt.s32.totalorder %s414_s1, %s414_s1 }
  0x41   :  { %317 = vmatmul.mubr.msk.f32.vlgmr.msra.gmra.mrb[0].mxu1 %vm161_vm2, %v65_v12  ;;  %p421_p13 = por %p420_p12, %p419_p11 }
  0x43   :  { %p422_p0 = pnand %p421_p13, %p415_p10 }
  0xba   :  { %v263_v34 = vpop.permute.xlu1 %262 }
  0xbe   :  { %v257_v36 = vpop.permute.xlu1 %256 }
  0xbf   :  { %v259_v37 = vmul.f32 %v257_v36, %v65_v12 }
 0x110   :  { %v146_v16 = vpop.f32.mrb[0].mxu0 }
 0x111   :  { %v307_v18 = vpop.f32.mrb[1].mxu0  ;;  %v147_v23 = vadd.f32 %v288_v22, %v146_v16 }
 0x114   :  { %v231_v19 = vpop.f32.mrb[0].mxu1 }
 0x115   :  { %v232_v20 = vadd.f32 %v290_v17, %v231_v19  ;;  %v318_v21 = vpop.f32.mrb[1].mxu1 }
 0x117   :  { %243 = vrot.lane.b32.xlu0 %v232_v20, %s451_s20  ;;  %v235_v24 = vadd.f32 %v232_v20, %v147_v23 }
 0x119   :  { %v292_v25 = vmul.f32 -1.442695, %v235_v24 }
 0x11b   :  { %342 = vpow2.f32 %v292_v25 }
 0x125   :  { %v343_v26 = vpop.eup %342 }
 0x126   :  { %v239_v27 = vadd.f32 1.0, %v343_v26 }
 0x128   :  { %344 = vrcp.f32 %v239_v27 }
 0x132   :  { %v345_v28 = vpop.eup %344 }
 0x189   :  { %v244_v29 = vpop.permute.xlu0 %243 }
 0x18a   :  { %v246_v30 = vmul.f32 %v345_v28, %v244_v29 }
 0x18c   :  { %248 = vrot.lane.b32.xlu0 %v246_v30, %s452_s2 }
 0x1fe   :  { %v249_v31 = vpop.permute.xlu0 %248 }
 0x1ff   :  { %v251_v32 = vadd.f32 %v249_v31, %v147_v23 }
 0x201   :  { %346 = vtanh.f32 %v251_v32 }
 0x20b   :  { %v347_v33 = vpop.eup %346 }
 0x20c   :  { %v265_v35 = vmul.f32 %v347_v33, %v263_v34 }
 0x20e   :  { %267 = vrot.lane.b32.xlu0 %v265_v35, %s451_s20 }
 0x280   :  { %v268_v38 = vpop.permute.xlu0 %267 }
 0x281   :  { %v270_v39 = vadd.f32 %v268_v38, %v259_v37 }
 0x283   :  { %271 = vst.msk [vmem:[#allocation8] sm:$0xff] %vm161_vm2, %v270_v39 }
 0x284   :  { %425 = shalt.err (!%p422_p0)
}
 0x285   :  { %s426_s25 = scalar_lea.hbm %s566_s7, 128 }
 0x286   :  { %p427_p1 = scmp.ne.s32.totalorder %s566_s7, %s426_s25  ;;  %p430_p2 = scmp.lt.u32.totalorder %s426_s25, %s566_s7 }
 0x288   :  { %p432_p3 = pnand %p430_p2, %p427_p1 }
 0x28a   :  { %435 = shalt.err (!%p432_p3)
}
 0x28b   :  { %281 = dma.vmem_to_hbm [thread:$0]  %s279_s6, 128, %s566_s7, [#allocation4]  }
 0x28c   :  { %440 = dma.done.wait [#allocation4], 128  }
 0x28d   :  { %441 = vsyncadd [#allocation4], 4294967168 }
 0x28e   :  { %285 = vsyncpa [#allocation3], 1 }
 0x28f   :  { %286 = vsyncpa [#allocation6], 1 }
 0x290   :  { %287 = vsyncpa [#allocation4], 1 }

</bundles_post_ra>
